<compile_context>
chip_gen: v7x
topology: tpu7x:2x2x1
jax: 0.10.0
libtpu: 0.0.40
codegen_flags: <defaults>
</compile_context>

<pallas_src>
import functools

import jax
import jax.numpy as jnp
from jax import lax
from jax.experimental import pallas as pl
from jax.experimental.pallas import tpu as pltpu

EPS = 0.8                       # nn.BatchNorm1d(out_feat, 0.8) -> eps = 0.8
H1, H2 = 256, 128
_LANE = 128
_TILE_QUANT = 16                # multiple of 8 (f32 sublanes) and 16 (bf16 packing)
_DEFAULT_TILE_B = 1024          # big tiles: amortize ~0.35 us/grid-step overhead


def _round_up(x, m):
    return (x + m - 1) // m * m


def _pick_tile(batch, tile_b):
    if tile_b is not None:
        return _round_up(tile_b, _TILE_QUANT)
    tb = min(_DEFAULT_TILE_B, _round_up(batch, _TILE_QUANT))
    # Keep >= 2 batch tiles for non-tiny batches so the "parallel" grid axis can
    # feed both TensorCores on v7x (no-op on 1-TC chips).
    if batch > 4 * _TILE_QUANT and _round_up(batch, tb) // tb < 2:
        tb = _round_up((batch + 1) // 2, _TILE_QUANT)
    return tb


def _vmem_limit_bytes(tb, f_in, n_pad, n_tiles, act_bytes):
    """Honest tile working-set estimate (pass B dominates), with slack for Pallas
    double-buffering and compiler scratch; clamped well under v7x's 64 MiB."""
    streamed = tb * (f_in + H1 + H2 + n_pad) * act_bytes       # pipelined x/h1/h2/out tiles
    weights = (f_in * H1 + H1 * H2 + H2 * n_pad) * act_bytes   # VMEM-resident weights
    stats = n_tiles * 2 * (H1 + H2) * 4                        # resident partial stats
    interm = tb * (H1 + H2 + n_pad) * 4                        # in-kernel f32 intermediates
    est = 4 * streamed + 2 * (weights + stats) + interm
    return int(min(max(est, 32 << 20), 48 << 20))


# ----------------------------- kernel helpers --------------------------------

def _row_mask(tile_b, batch):
    """(1, tile_b) f32 mask selecting rows belonging to the real (unpadded) batch."""
    rows = lax.broadcasted_iota(jnp.int32, (1, tile_b), 1) + pl.program_id(0) * tile_b
    return (rows < batch).astype(jnp.float32)


def _write_stats(stats_ref, mask, h):
    """Masked per-feature sum / sum-of-squares via MXU mask-row dots (f32 accum).
    Two direct sub-view stores -- no sublane concat / relayout."""
    stats_ref[:, 0, :] = jnp.dot(mask, h, preferred_element_type=jnp.float32)
    stats_ref[:, 1, :] = jnp.dot(mask, h * h, preferred_element_type=jnp.float32)


def _linear_f32(x, w_ref, b_ref):
    return jnp.dot(x, w_ref[...], preferred_element_type=jnp.float32) + b_ref[...]


def _bn_scale_shift(stats_ref, g_ref, be_ref, inv_b):
    """In-kernel BN finalize: reduce per-tile partials and fold BN + affine into a
    per-feature scale/shift.  Recomputed per tile (it is n_tiles x 2 x H floats)."""
    st = stats_ref[...]                                        # (n_tiles, 2, H) f32
    s_tot = jnp.sum(st[:, 0, :], axis=0, keepdims=True)        # (1, H)
    sq_tot = jnp.sum(st[:, 1, :], axis=0, keepdims=True)       # (1, H)
    mu = s_tot * inv_b
    var = sq_tot * inv_b - mu * mu                             # biased (training) var;
    scale = g_ref[...] * lax.rsqrt(var + EPS)                  # eps=0.8 dominates cancellation
    shift = be_ref[...] - mu * scale
    return scale, shift


def _bn_relu(h, stats_ref, g_ref, be_ref, inv_b):
    scale, shift = _bn_scale_shift(stats_ref, g_ref, be_ref, inv_b)
    return jnp.maximum(h * scale + shift, 0.0)


# ----------------------------- kernels ---------------------------------------

def _l1_stats_kernel(x_ref, w1_ref, b1_ref, stats_ref, *, tile_b, batch):
    """Pass A: partial batch stats of h1 = x @ W1 + b1 (h1 not materialized)."""
    h = _linear_f32(x_ref[...], w1_ref, b1_ref)
    _write_stats(stats_ref, _row_mask(tile_b, batch), h)


def _l1_act_stats_kernel(x_ref, w1_ref, b1_ref, h_ref, stats_ref, *, tile_b, batch):
    """Fallback pass 1: h1 = x @ W1 + b1 (stored) + partial batch stats."""
    h = _linear_f32(x_ref[...], w1_ref, b1_ref)
    h_ref[...] = h.astype(h_ref.dtype)
    _write_stats(stats_ref, _row_mask(tile_b, batch), h)


def _fused_l1_bn_l2_kernel(x_ref, w1_ref, b1_ref, stats1_ref, g1_ref, be1_ref,
                           w2_ref, b2_ref, h2_ref, stats2_ref, *,
                           tile_b, batch, inv_b):
    """Pass B: recompute Linear1, apply BN1+ReLU, Linear2; emit h2 + its stats."""
    h1 = _linear_f32(x_ref[...], w1_ref, b1_ref)
    a = _bn_relu(h1, stats1_ref, g1_ref, be1_ref, inv_b)
    h2 = _linear_f32(a.astype(w2_ref.dtype), w2_ref, b2_ref)
    h2_ref[...] = h2.astype(h2_ref.dtype)                      # bf16 storage in bf16 mode
    _write_stats(stats2_ref, _row_mask(tile_b, batch), h2)     # stats from f32 accum


def _bn_l_kernel(h_ref, stats_ref, g_ref, be_ref, w_ref, b_ref, out_ref,
                 *maybe_stats_ref, tile_b, batch, inv_b):
    """BN + ReLU + Linear (used for fallback pass 2 and for pass C)."""
    a = _bn_relu(h_ref[...].astype(jnp.float32), stats_ref, g_ref, be_ref, inv_b)
    out = _linear_f32(a.astype(w_ref.dtype), w_ref, b_ref)
    out_ref[...] = out.astype(out_ref.dtype)
    if maybe_stats_ref:
        (s_ref,) = maybe_stats_ref
        _write_stats(s_ref, _row_mask(tile_b, batch), out)


# ----------------------------- wrapper ----------------------------------------

def bpnet_forward(x, params, *, matmul_dtype=jnp.bfloat16, tile_b=None,
                  recompute_l1=None, input_buffering=2):
    """Training-mode BpNet forward.  bf16 matmuls + bf16 stage-boundary activations
    by default (fast path); pass matmul_dtype=jnp.float32 for the exact-f32 path."""
    (w1, b1, g1, be1, w2, b2, g2, be2, w3, b3) = params
    B, f_in = x.shape
    out_dim = w3.shape[1]
    if recompute_l1 is None:
        recompute_l1 = f_in <= 2 * H1   # re-reading x beats round-tripping Bx256 h1

    tb = _pick_tile(B, tile_b)
    b_pad = _round_up(B, tb)
    n_tiles = b_pad // tb
    inv_b = 1.0 / B
    store_dtype = matmul_dtype          # activation storage dtype at stage boundaries

    x = x.astype(matmul_dtype)          # cast once in the wrapper
    if b_pad != B:
        x = jnp.pad(x, ((0, b_pad - B), (0, 0)))

    # Lane-dense output head: pad final weight/bias to a multiple of 128 lanes.
    n_pad = _round_up(out_dim, _LANE)
    if n_pad != out_dim:
        w3 = jnp.pad(w3, ((0, 0), (0, n_pad - out_dim)))
        b3 = jnp.pad(b3, ((0, 0), (0, n_pad - out_dim)))
    w1m, w2m, w3m = (w.astype(matmul_dtype) for w in (w1, w2, w3))

    cparams = pltpu.CompilerParams(
        dimension_semantics=("parallel",),   # independent batch tiles -> megacore
        vmem_limit_bytes=_vmem_limit_bytes(tb, f_in, n_pad, n_tiles,
                                           jnp.dtype(matmul_dtype).itemsize),
    )

    def stream_spec(feat):
        kw = {}
        if input_buffering and input_buffering != 2:
            kw["pipeline_mode"] = pl.Buffered(input_buffering)
        return pl.BlockSpec((tb, feat), lambda i: (i, 0), **kw)

    def out_tile_spec(feat):
        return pl.BlockSpec((tb, feat), lambda i: (i, 0))

    def resident(arr):
        return pl.BlockSpec(arr.shape, lambda i: (0,) * arr.ndim)

    def stats_spec(feat):
        return pl.BlockSpec((1, 2, feat), lambda i: (i, 0, 0))

    def stats_shape(feat):
        return jax.ShapeDtypeStruct((n_tiles, 2, feat), jnp.float32)

    common = dict(tile_b=tb, batch=B)

    if recompute_l1:
        # ---- pass A: stats of Linear1 only (h1 never touches HBM) -------------
        s1 = pl.pallas_call(
            functools.partial(_l1_stats_kernel, **common),
            grid=(n_tiles,),
            in_specs=[stream_spec(f_in), resident(w1m), resident(b1)],
            out_specs=stats_spec(H1),
            out_shape=stats_shape(H1),
            compiler_params=cparams,
        )(x, w1m, b1)

        # ---- pass B: recompute Linear1 + BN1 + ReLU + Linear2 + stats2 --------
        h2, s2 = pl.pallas_call(
            functools.partial(_fused_l1_bn_l2_kernel, inv_b=inv_b, **common),
            grid=(n_tiles,),
            in_specs=[stream_spec(f_in), resident(w1m), resident(b1), resident(s1),
                      resident(g1), resident(be1), resident(w2m), resident(b2)],
            out_specs=[out_tile_spec(H2), stats_spec(H2)],
            out_shape=[jax.ShapeDtypeStruct((b_pad, H2), store_dtype),
                       stats_shape(H2)],
            compiler_params=cparams,
        )(x, w1m, b1, s1, g1, be1, w2m, b2)
    else:
        # ---- fallback pass 1: Linear1 (materialized) + stats -------------------
        h1, s1 = pl.pallas_call(
            functools.partial(_l1_act_stats_kernel, **common),
            grid=(n_tiles,),
            in_specs=[stream_spec(f_in), resident(w1m), resident(b1)],
            out_specs=[out_tile_spec(H1), stats_spec(H1)],
            out_shape=[jax.ShapeDtypeStruct((b_pad, H1), store_dtype),
                       stats_shape(H1)],
            compiler_params=cparams,
        )(x, w1m, b1)

        # ---- fallback pass 2: BN1 + ReLU + Linear2 + stats2 ---------------------
        h2, s2 = pl.pallas_call(
            functools.partial(_bn_l_kernel, inv_b=inv_b, **common),
            grid=(n_tiles,),
            in_specs=[stream_spec(H1), resident(s1), resident(g1), resident(be1),
                      resident(w2m), resident(b2)],
            out_specs=[out_tile_spec(H2), stats_spec(H2)],
            out_shape=[jax.ShapeDtypeStruct((b_pad, H2), store_dtype),
                       stats_shape(H2)],
            compiler_params=cparams,
        )(h1, s1, g1, be1, w2m, b2)

    # ---- pass C: BN2 + ReLU + Linear3 (lane-padded head) -----------------------
    out = pl.pallas_call(
        functools.partial(_bn_l_kernel, inv_b=inv_b, **common),
        grid=(n_tiles,),
        in_specs=[stream_spec(H2), resident(s2), resident(g2), resident(be2),
                  resident(w3m), resident(b3)],
        out_specs=out_tile_spec(n_pad),
        out_shape=jax.ShapeDtypeStruct((b_pad, n_pad), jnp.float32),
        compiler_params=cparams,
    )(h2, s2, g2, be2, w3m, b3)

    return out[:B, :out_dim]


# ----------------------------- init & reference --------------------------------

def init_params(key, input_shape, output_shape):
    """Deterministic synthetic init. Linear weights stored as (in, out);
    biases / BN params stored as (1, out) for clean lane broadcast in-kernel."""
    ks = jax.random.split(key, 3)

    def lin(k, fan_in, fan_out):
        bound = 1.0 / jnp.sqrt(fan_in)
        kw, kb = jax.random.split(k)
        w = jax.random.uniform(kw, (fan_in, fan_out), jnp.float32, -bound, bound)
        b = jax.random.uniform(kb, (1, fan_out), jnp.float32, -bound, bound)
        return w, b

    w1, b1 = lin(ks[0], input_shape, H1)
    w2, b2 = lin(ks[1], H1, H2)
    w3, b3 = lin(ks[2], H2, output_shape)
    # BatchNorm affine params at PyTorch init: gamma=1, beta=0
    g1, be1 = jnp.ones((1, H1), jnp.float32), jnp.zeros((1, H1), jnp.float32)
    g2, be2 = jnp.ones((1, H2), jnp.float32), jnp.zeros((1, H2), jnp.float32)
    return (w1, b1, g1, be1, w2, b2, g2, be2, w3, b3)


def bpnet_reference(x, params, *, matmul_dtype=jnp.float32):
    """Pure-JAX reference mirroring PyTorch training-mode forward."""
    (w1, b1, g1, be1, w2, b2, g2, be2, w3, b3) = params

    def mm(a, w):
        return jnp.dot(a.astype(matmul_dtype), w.astype(matmul_dtype),
                       preferred_element_type=jnp.float32)

    def block(h, w, b, g, be):
        h = mm(h, w) + b
        mu = jnp.mean(h, axis=0, keepdims=True)
        var = jnp.mean((h - mu) ** 2, axis=0, keepdims=True)
        h = (h - mu) / jnp.sqrt(var + EPS)
        h = h * g + be
        return jnp.maximum(h, 0.0)

    h = block(x, w1, b1, g1, be1)
    h = block(h, w2, b2, g2, be2)
    return mm(h, w3) + b3


if __name__ == "__main__":
    key = jax.random.PRNGKey(0)
    kx, kp, kx2 = jax.random.split(key, 3)

    batch, input_shape, output_shape = 8, 32, 16
    x = jax.random.normal(kx, (batch, input_shape), jnp.float32)
    params = init_params(kp, input_shape, output_shape)

    # Exact-f32 path (fused / recompute-Linear1 variant): tight match vs reference.
    out_f32 = bpnet_forward(x, params, matmul_dtype=jnp.float32)
    jax.block_until_ready(out_f32)
    ref_f32 = bpnet_reference(x, params, matmul_dtype=jnp.float32)
    assert out_f32.shape == (batch, output_shape)
    assert jnp.allclose(out_f32, ref_f32, atol=1e-4, rtol=1e-4), "f32 (fused) mismatch"

    # Exact-f32 path, materialized-h1 fallback variant.
    out_mat = bpnet_forward(x, params, matmul_dtype=jnp.float32, recompute_l1=False)
    jax.block_until_ready(out_mat)
    assert jnp.allclose(out_mat, ref_f32, atol=1e-4, rtol=1e-4), "f32 (materialized) mismatch"

    # Default fast path: bf16 matmuls + bf16 stage-boundary activations.
    out_bf16 = bpnet_forward(x, params)
    jax.block_until_ready(out_bf16)
    ref_bf16 = bpnet_reference(x, params, matmul_dtype=jnp.bfloat16)
    assert out_bf16.shape == (batch, output_shape) and out_bf16.dtype == jnp.float32
    assert jnp.allclose(out_bf16, ref_bf16, atol=3e-2, rtol=3e-2), "bf16 mismatch"

    # Multi-tile + padded-batch + masked-stats exercise (B=100 -> 2 tiles, odd head).
    b_mt, out_mt_dim = 100, 10
    x_mt = jax.random.normal(kx2, (b_mt, input_shape), jnp.float32)
    params_mt = init_params(kp, input_shape, out_mt_dim)
    out_mt = bpnet_forward(x_mt, params_mt, matmul_dtype=jnp.float32)
    jax.block_until_ready(out_mt)
    ref_mt = bpnet_reference(x_mt, params_mt, matmul_dtype=jnp.float32)
    assert out_mt.shape == (b_mt, out_mt_dim)
    assert jnp.allclose(out_mt, ref_mt, atol=1e-4, rtol=1e-4), "multi-tile f32 mismatch"

    print("KERNEL_OK")
</pallas_src>

<mosaic_0001>
module attributes {stable_mosaic.version = 11 : i64} {
  func.func @_l1_stats_kernel(%arg0: i32, %arg1: memref<16x32xf32, #tpu.memory_space<vmem>>, %arg2: memref<32x256xf32, #tpu.memory_space<vmem>>, %arg3: memref<1x256xf32, #tpu.memory_space<vmem>>, %arg4: memref<1x2x256xf32, #tpu.memory_space<vmem>>) attributes {dimension_semantics = [#tpu.dimension_semantics<parallel>], iteration_bounds = array<i64: 1>, scalar_prefetch = 0 : i64, scratch_operands = 0 : i64, tpu.core_type = #tpu.core_type<tc>, window_params = [{transform_indices = @transform_0, window_bounds = array<i64: 16, 32>}, {pipeline_mode = #tpu.pipeline_mode<synchronous>, transform_indices = @transform_1, window_bounds = array<i64: 32, 256>}, {pipeline_mode = #tpu.pipeline_mode<synchronous>, transform_indices = @transform_2, window_bounds = array<i64: 1, 256>}, {transform_indices = @transform_3, window_bounds = array<i64: 1, 2, 256>}]} {
    %c0 = arith.constant 0 : index
    %c0_0 = arith.constant 0 : index
    %0 = vector.load %arg1[%c0, %c0_0] : memref<16x32xf32, #tpu.memory_space<vmem>>, vector<16x32xf32>
    %c0_1 = arith.constant 0 : index
    %c0_2 = arith.constant 0 : index
    %1 = vector.load %arg2[%c0_1, %c0_2] : memref<32x256xf32, #tpu.memory_space<vmem>>, vector<32x256xf32>
    %cst = arith.constant dense<0.000000e+00> : vector<16x256xf32>
    %2 = tpu.matmul %0, %1, %cst {dimension_numbers = #tpu.dot_dimension_numbers<[1], [0], [0], [1], [0, 0, 1, 1], [], []>} : vector<16x32xf32>, vector<32x256xf32>, vector<16x256xf32> -> vector<16x256xf32>
    %c0_3 = arith.constant 0 : index
    %c0_4 = arith.constant 0 : index
    %3 = vector.load %arg3[%c0_3, %c0_4] : memref<1x256xf32, #tpu.memory_space<vmem>>, vector<1x256xf32>
    %4 = vector.broadcast %3 : vector<1x256xf32> to vector<16x256xf32>
    %5 = arith.addf %2, %4 : vector<16x256xf32>
    %6 = tpu.iota {dimensions = array<i32: 1>} : vector<1x16xi32>
    %c16_i32 = arith.constant 16 : i32
    %7 = arith.muli %arg0, %c16_i32 : i32
    %8 = vector.broadcast %7 : i32 to vector<1x16xi32>
    %9 = arith.addi %6, %8 : vector<1x16xi32>
    %c8_i32 = arith.constant 8 : i32
    %10 = vector.broadcast %c8_i32 : i32 to vector<1x16xi32>
    %11 = arith.cmpi slt, %9, %10 : vector<1x16xi32>
    %12 = arith.extui %11 : vector<1x16xi1> to vector<1x16xi32>
    %13 = arith.sitofp %12 : vector<1x16xi32> to vector<1x16xf32>
    %cst_5 = arith.constant dense<0.000000e+00> : vector<1x256xf32>
    %14 = tpu.matmul %13, %5, %cst_5 {dimension_numbers = #tpu.dot_dimension_numbers<[1], [0], [0], [1], [0, 0, 1, 1], [], []>} : vector<1x16xf32>, vector<16x256xf32>, vector<1x256xf32> -> vector<1x256xf32>
    %c0_6 = arith.constant 0 : index
    %c0_7 = arith.constant 0 : index
    %c0_8 = arith.constant 0 : index
    %15 = vector.load %arg4[%c0_6, %c0_7, %c0_8] : memref<1x2x256xf32, #tpu.memory_space<vmem>>, vector<1x1x256xf32>
    %16 = vector.shape_cast %15 : vector<1x1x256xf32> to vector<1x256xf32>
    %17 = vector.shape_cast %14 : vector<1x256xf32> to vector<1x1x256xf32>
    tpu.vector_store %arg4[%c0_6, %c0_7, %c0_8], %17 {strides = array<i32>} : memref<1x2x256xf32, #tpu.memory_space<vmem>>, vector<1x1x256xf32>,
    %18 = arith.mulf %5, %5 : vector<16x256xf32>
    %cst_9 = arith.constant dense<0.000000e+00> : vector<1x256xf32>
    %19 = tpu.matmul %13, %18, %cst_9 {dimension_numbers = #tpu.dot_dimension_numbers<[1], [0], [0], [1], [0, 0, 1, 1], [], []>} : vector<1x16xf32>, vector<16x256xf32>, vector<1x256xf32> -> vector<1x256xf32>
    %c0_10 = arith.constant 0 : index
    %c1 = arith.constant 1 : index
    %c0_11 = arith.constant 0 : index
    %20 = vector.load %arg4[%c0_10, %c1, %c0_11] : memref<1x2x256xf32, #tpu.memory_space<vmem>>, vector<1x1x256xf32>
    %21 = vector.shape_cast %20 : vector<1x1x256xf32> to vector<1x256xf32>
    %22 = vector.shape_cast %19 : vector<1x256xf32> to vector<1x1x256xf32>
    tpu.vector_store %arg4[%c0_10, %c1, %c0_11], %22 {strides = array<i32>} : memref<1x2x256xf32, #tpu.memory_space<vmem>>, vector<1x1x256xf32>,
    return
  }
  func.func @transform_0(%arg0: i32) -> (i32, i32) {
    %c0_i32 = arith.constant 0 : i32
    %c0_i32_0 = arith.constant 0 : i32
    return %arg0, %c0_i32 : i32, i32
  }
  func.func @transform_1(%arg0: i32) -> (i32, i32) {
    %c0_i32 = arith.constant 0 : i32
    %c0_i32_0 = arith.constant 0 : i32
    %c0_i32_1 = arith.constant 0 : i32
    return %c0_i32, %c0_i32_0 : i32, i32
  }
  func.func @transform_2(%arg0: i32) -> (i32, i32) {
    %c0_i32 = arith.constant 0 : i32
    %c0_i32_0 = arith.constant 0 : i32
    %c0_i32_1 = arith.constant 0 : i32
    return %c0_i32, %c0_i32_0 : i32, i32
  }
  func.func @transform_3(%arg0: i32) -> (i32, i32, i32) {
    %c0_i32 = arith.constant 0 : i32
    %c0_i32_0 = arith.constant 0 : i32
    %c0_i32_1 = arith.constant 0 : i32
    return %arg0, %c0_i32, %c0_i32_0 : i32, i32, i32
  }
}

</mosaic_0001>

<bundles_post_ra>
// kernel: tpu_custom_call.1
= control target key start
LH: loop header
LB: loop body
LE: loop exit
PB: predicated region body
PF: predicated region fallthrough
CT: control target
= control target key end

     0   :  { %8 = vsyncpa [#allocation3], 0  ;;  %s536_s0 = inlined_call_operand.hbm [shape: f32[16,32], index: 0, kind: input, shape index: {}]   ;;  %s537_s1 = inlined_call_operand.hbm [shape: f32[32,256], index: 1, kind: input, shape index: {}]   ;;  %s538_s2 = inlined_call_operand.vmem [shape: f32[1,256], index: 2, kind: input, shape index: {}]   ;;  %s539_s3 = inlined_call_operand.hbm [shape: f32[1,2,256], index: 3, kind: output, shape index: {}]  }
   0x1   :  { %9 = vsyncpa [#allocation6], 0 }
   0x2   :  { %10 = vsyncpa [#allocation4], 0  ;;  %s468_s12 = smov [#allocation2]   ;;  %s396_s16 = scalar_lea.hbm %s536_s0, 256 }
   0x3   :  { %s16_s13 = sshll.u32 %s468_s12, 4  ;;  %p397_p0 = scmp.ne.s32.totalorder %s536_s0, %s396_s16  ;;  %s17_s13 = int_to_ptr.vmem [resolvable:$true] %s16_s13 }
   0x4   :  { %p400_p1 = scmp.lt.u32.totalorder %s396_s16, %s536_s0 }
   0x6   :  { %p402_p2 = pnand %p400_p1, %p397_p0 }
   0x8   :  { %405 = shalt.err (!%p402_p2)
}
   0x9   :  { %s406_s21 = scalar_lea.vmem %s17_s13, 256  ;;  %p411_p4 = scmp.lt.s32.totalorder %s17_s13, %s17_s13 }
   0xa   :  { %p407_p3 = scmp.ne.s32.totalorder %s17_s13, %s406_s21  ;;  %p412_p5 = scmp.lt.s32.totalorder %s406_s21, %s406_s21 }
   0xc   :  { %p413_p6 = por %p412_p5, %p411_p4 }
   0xe   :  { %p414_p7 = pnand %p413_p6, %p407_p3 }
  0x10   :  { %417 = shalt.err (!%p414_p7)
}
  0x11   :  { %s469_s22 = smov 128   ;;  %s470_s23 = smov 8  }
  0x12   :  { %22 = dma.hbm_to_vmem [thread:$0]  %s536_s0, 256, %s17_s13, [#allocation3], %s469_s22, %s469_s22, %s470_s23  }
  0x13   :  { %s471_s26 = smov [#allocation5]   ;;  %s418_s30 = scalar_lea.hbm %s537_s1, 1024 }
  0x14   :  { %s28_s27 = sshll.u32 %s471_s26, 4  ;;  %p419_p8 = scmp.ne.s32.totalorder %s537_s1, %s418_s30  ;;  %s29_s27 = int_to_ptr.vmem [resolvable:$true] %s28_s27 }
  0x15   :  { %p422_p9 = scmp.lt.u32.totalorder %s418_s30, %s537_s1 }
  0x17   :  { %p424_p10 = pnand %p422_p9, %p419_p8 }
  0x19   :  { %427 = shalt.err (!%p424_p10)
}
  0x1a   :  { %s428_s8 = scalar_lea.vmem %s29_s27, 1024  ;;  %p433_p12 = scmp.lt.s32.totalorder %s29_s27, %s29_s27 }
  0x1b   :  { %p429_p11 = scmp.ne.s32.totalorder %s29_s27, %s428_s8  ;;  %p434_p13 = scmp.lt.s32.totalorder %s428_s8, %s428_s8 }
  0x1d   :  { %p435_p0 = por %p434_p13, %p433_p12 }
  0x1f   :  { %p436_p1 = pnand %p435_p0, %p429_p11 }
  0x21   :  { %439 = shalt.err (!%p436_p1)
}
  0x22   :  { %s472_s0 = smov 256   ;;  %s473_s9 = smov 16  }
  0x23   :  { %34 = dma.hbm_to_vmem [thread:$0]  %s537_s1, 1024, %s29_s27, [#allocation6], %s472_s0, %s472_s0, %s473_s9  }
  0x24   :  { %462 = dma.done.wait [#allocation3], 256  }
  0x25   :  { %463 = vsyncadd [#allocation3], 4294967040 }
  0x26   :  { %464 = dma.done.wait [#allocation6], 1024  }
  0x27   :  { %465 = vsyncadd [#allocation6], 4294966272  ;;  %v474_v0 = vmov 0.0   ;;  %v46_v1 = vld [vmem:[#allocation5 + $0x8] sm:$0xff]  ;;  %v48_v2 = vld [vmem:[#allocation5 + $0x18] sm:$0xff]  ;;  %vm65_vm0 = vcmask 261120   ;;  %v55_v15 = vlaneseq }
  0x28   :  { %136 = vmatprep.mubr.f32.mxu0 %v474_v0  ;;  %225 = vmatprep.mubr.f32.mxu1 %v474_v0  ;;  %v45_v3 = vld [vmem:[#allocation5] sm:$0xff]  ;;  %v371_v4 = vpack.c.bf16 %v48_v2, %v46_v1  ;;  %v47_v5 = vld [vmem:[#allocation5 + $0x10] sm:$0xff]  ;;  %v50_v6 = vld [vmem:[#allocation5 + $0x28] sm:$0xff]  ;;  %vm157_vm2 = vcmask 130048   ;;  %v475_v40 = vmov 1966171168  }
  0x29   :  { %v52_v7 = vld [vmem:[#allocation5 + $0x38] sm:$0xff]  ;;  %v373_v8 = vpack.c.bf16 %v47_v5, %v45_v3  ;;  %v49_v10 = vld [vmem:[#allocation5 + $0x20] sm:$0xff]  ;;  %v51_v11 = vld [vmem:[#allocation5 + $0x30] sm:$0xff]  ;;  %v56_v16 = vshrl.u32 %v55_v15, 7  ;;  %v150_v27 = vand.u32 127, %v55_v15  ;;  %v236_v41 = vunpack.c.l.s4 %v475_v40 }
  0x2a   :  { %v375_v9 = vpack.c.bf16 %v52_v7, %v50_v6  ;;  %372 = vmatprep.subr.bf16.mxu0 %v371_v4  ;;  %v377_v12 = vpack.c.bf16 %v51_v11, %v49_v10  ;;  %v43_v13 = vld [vmem:[#allocation2] sm:$0xff]  ;;  %v44_v14 = vld [vmem:[#allocation2 + $0x8] sm:$0xff]  ;;  %vm252_vm3 = vcmp.lt.s32.totalorder %v55_v15, 256 }
  0x2b   :  { %374 = vmatpush1.bf16.msra.mxu0 %v373_v8  ;;  %v57_v17 = vsub.s32 0, %v56_v16  ;;  %v53_v18 = vld [vmem:[%s538_s2] sm:$0x3]  ;;  %v61_v19 = vsub.s32 1, %v56_v16  ;;  %vm154_vm1 = vcmp.lt.s32.totalorder %v150_v27, 8  ;;  %v237_v42 = vunpack.c.0.s8 %v236_v41  ;;  %s476_s2 = smov [#allocation7]  }
  0x2c   :  { %376 = vmatprep.subr.bf16.mxu0 %v375_v9  ;;  %v368_v39 = vsel %vm154_vm1, 1.0, %v474_v0  ;;  %s356_s13 = sshll.u32 %s476_s2, 4  ;;  %s357_s13 = int_to_ptr.vmem [resolvable:$true] %s356_s13 }
  0x2d   :  { %v58_v20 = vrot.slane %v53_v18, %v57_v17  ;;  %v62_v22 = vrot.slane %v53_v18, %v61_v19  ;;  %v240_v44 = vsub.s32 %v237_v42, %v56_v16  ;;  %s440_s14 = scalar_lea.vmem %s357_s13, 64  ;;  %p445_p3 = scmp.lt.s32.totalorder %s357_s13, %s357_s13 }
  0x2e   :  { %p441_p2 = scmp.ne.s32.totalorder %s357_s13, %s440_s14  ;;  %p446_p4 = scmp.lt.s32.totalorder %s440_s14, %s440_s14 }
  0x2f   :  { %378 = vmatpush1.bf16.msra.mxu0 %v377_v12 }
  0x30   :  { %p447_p5 = por %p446_p4, %p445_p3 }
  0x32   :  { %366 = vmatmul.mubr.msk.f32.vlgmr.msra.gmra.mrb[0].mxu0 %vm65_vm0, %v43_v13  ;;  %p448_p6 = pnand %p447_p5, %p441_p2 }
  0x33   :  { %142 = vmatprep.mubr.f32.mxu0 %v474_v0 }
  0x36   :  { %367 = vmatmul.mubr.msk.f32.gmra.mrb[2].mxu0 %vm65_vm0, %v44_v14 }
 0x105   :  { %v138_v21 = vpop.f32.mrb[0].mxu0 }
 0x106   :  { %v140_v23 = vpop.f32.mrb[1].mxu0  ;;  %v139_v24 = vadd.f32 %v138_v21, %v58_v20 }
 0x107   :  { %v141_v25 = vadd.f32 %v140_v23, %v62_v22 }
 0x108   :  { %v255_v31 = vmul.f32 %v139_v24, %v139_v24 }
 0x109   :  { %v144_v26 = vpop.f32.mrb[2].mxu0  ;;  %v256_v34 = vmul.f32 %v141_v25, %v141_v25 }
 0x10a   :  { %v145_v28 = vadd.f32 %v144_v26, %v58_v20  ;;  %v146_v29 = vpop.f32.mrb[3].mxu0 }
 0x10b   :  { %v147_v30 = vadd.f32 %v146_v29, %v62_v22 }
 0x10c   :  { %v257_v32 = vmul.f32 %v145_v28, %v145_v28  ;;  %v381_v33 = vpack.c.bf16 %v145_v28, %v139_v24 }
 0x10d   :  { %v258_v35 = vmul.f32 %v147_v30, %v147_v30  ;;  %v379_v36 = vpack.c.bf16 %v147_v30, %v141_v25 }
 0x10e   :  { %v385_v37 = vpack.c.bf16 %v257_v32, %v255_v31 }
 0x10f   :  { %380 = vmatprep.subr.bf16.mxu1 %v379_v36  ;;  %v383_v38 = vpack.c.bf16 %v258_v35, %v256_v34 }
 0x110   :  { %382 = vmatpush1.bf16.msra.mxu1 %v381_v33 }
 0x111   :  { %384 = vmatprep.subr.bf16.mxu1 %v383_v38 }
 0x113   :  { %369 = vmatmul.mubr.msk.f32.vlgmr.msra.gmra.mrb[0].mxu1 %vm157_vm2, %v368_v39 }
 0x114   :  { %386 = vmatpush1.bf16.msra.mxu1 %v385_v37  ;;  %323 = vmatprep.mubr.f32.mxu1 %v474_v0 }
 0x117   :  { %370 = vmatmul.mubr.msk.f32.vlgmr.msra.gmra.mrb[2].mxu1 %vm157_vm2, %v368_v39 }
 0x1e6   :  { %v227_v43 = vpop.f32.mrb[0].mxu1 }
 0x1e7   :  { %v229_v45 = vpop.f32.mrb[1].mxu1 }
 0x1e8   :  { %v234_v46 = vcombine.low %v227_v43, %v229_v45 }
 0x1ea   :  { %v241_v47 = vrot.slane %v234_v46, %v240_v44  ;;  %v325_v48 = vpop.f32.mrb[2].mxu1 }
 0x1eb   :  { %v327_v49 = vpop.f32.mrb[3].mxu1 }
 0x1ec   :  { %v248_v50 = vrot.slane %v241_v47, %v240_v44  ;;  %v332_v51 = vcombine.low %v325_v48, %v327_v49 }
 0x1ee   :  { %v339_v52 = vrot.slane %v332_v51, %v240_v44  ;;  %254 = vst.msk [vmem:[#allocation7] ss:$2 sm:$0x3] %vm252_vm3, %v248_v50 }
 0x1f0   :  { %v346_v53 = vrot.slane %v339_v52, %v240_v44 }
 0x1f2   :  { %349 = vst.msk [vmem:[#allocation7 + $0x1] ss:$2 sm:$0x3] %vm252_vm3, %v346_v53 }
 0x1f3   :  { %451 = shalt.err (!%p448_p6)
}
 0x1f4   :  { %s452_s17 = scalar_lea.hbm %s539_s3, 64 }
 0x1f5   :  { %p453_p7 = scmp.ne.s32.totalorder %s539_s3, %s452_s17  ;;  %p456_p8 = scmp.lt.u32.totalorder %s452_s17, %s539_s3 }
 0x1f7   :  { %p458_p9 = pnand %p456_p8, %p453_p7 }
 0x1f9   :  { %461 = shalt.err (!%p458_p9)
}
 0x1fa   :  { %359 = dma.vmem_to_hbm [thread:$0]  %s357_s13, 64, %s539_s3, [#allocation4]  }
 0x1fb   :  { %466 = dma.done.wait [#allocation4], 64  }
 0x1fc   :  { %467 = vsyncadd [#allocation4], 4294967232 }
 0x1fd   :  { %363 = vsyncpa [#allocation3], 1 }
 0x1fe   :  { %364 = vsyncpa [#allocation6], 1 }
 0x1ff   :  { %365 = vsyncpa [#allocation4], 1 }

</bundles_post_ra>
